<compile_context>
chip_gen: v7x
topology: tpu7x:2x2x1
jax: 0.10.0
libtpu: 0.0.40
codegen_flags: <defaults>
</compile_context>

<pallas_src>
import jax
import jax.numpy as jnp
from jax.experimental import pallas as pl
from jax.experimental.pallas import tpu as pltpu


_SEG_ALIGN = 16  # bf16 packs 2 rows/sublane -> 16-row tiles; keeps every slice a view.


def _round_up(n, m):
    return (n + m - 1) // m * m


# ----------------------------------- kernel -----------------------------------

def _make_projector_kernel(n_hidden_layers, input_size, hidden, out_dims,
                           r_in, r_h, r_o):
    """Kernel body for static layer count / sizes. Activations are (features, TM)
    with the batch on the lane axis; r_* are the 16-row-aligned segment heights."""

    def kernel(x_ref, p_ref, out_ref):
        xT = x_ref[...]                                   # (input_size, TM) bf16

        r = 0
        # --- fused first layer + scaler row: one MXU pass ---
        w_in = p_ref[r:r + r_in, 0:input_size]; r += r_in             # (r_in, in) bf16
        b_in = p_ref[r:r + r_in, 0:1].astype(jnp.float32); r += r_in  # (r_in, 1)
        h_full = jnp.dot(w_in, xT, preferred_element_type=jnp.float32) + b_in
        s_logit = h_full[hidden:hidden + 1, :]            # (1, TM) scaler pre-activation
        h = jnp.maximum(h_full[0:hidden, :], 0.0)         # ReLU; dropout = identity (eval)

        for _ in range(n_hidden_layers):                  # static, small -> unrolled
            w_h = p_ref[r:r + r_h, 0:hidden]; r += r_h
            b_h = p_ref[r:r + r_h, 0:1].astype(jnp.float32); r += r_h
            h = jnp.dot(w_h, h.astype(jnp.bfloat16),
                        preferred_element_type=jnp.float32) + b_h
            h = jnp.maximum(h[0:hidden, :], 0.0)

        w_out = p_ref[r:r + r_o, 0:hidden]; r += r_o
        b_out = p_ref[r:r + r_o, 0:1].astype(jnp.float32); r += r_o
        d = jnp.dot(w_out, h.astype(jnp.bfloat16),
                    preferred_element_type=jnp.float32) + b_out
        d = d[0:out_dims, :]                              # (out_dims, TM)

        # Per-sample L2 norm = reduce over the feature (sublane) axis. No epsilon:
        # matches torch `output.div(norms)` exactly.
        norm_sq = jnp.sum(d * d, axis=0, keepdims=True)   # (1, TM)
        direction = d * jax.lax.rsqrt(norm_sq)

        # Exact sigmoid on a single (1, TM) row: exp on the EUP, one divide.
        scalers = 1.0 / (1.0 + jnp.exp(-s_logit))

        out_ref[...] = (direction * scalers).astype(out_ref.dtype)

    return kernel


# ----------------------------------- wrapper -----------------------------------

def projector_forward(x, packed, *, input_size, hidden, out_dims,
                      n_hidden_layers, tm_max=2048):
    """Batch-tiled pallas_call in the transposed (feature-major) orientation.

    Batch rows become lane columns; the tile width tm is a multiple of 128 and is
    chosen so the grid has >=2 steps when the (padded) batch allows it, which lets the
    v7x megacore split the grid across both TensorCores."""
    B = x.shape[0]
    Bp0 = _round_up(B, 128)                       # lane alignment for the batch axis
    n_tiles = pl.cdiv(Bp0, tm_max)
    if Bp0 >= 2 * 128:
        n_tiles = max(n_tiles, 2)                 # >=2 grid steps -> both v7x TCs busy
    tm = _round_up(pl.cdiv(Bp0, n_tiles), 128)
    Bp = tm * n_tiles
    grid = (n_tiles,)

    if Bp != B:
        # Pad with 1.0 (not 0.0): padded columns then produce finite garbage instead of
        # a 0-direction -> rsqrt(0)=inf -> NaN.  Padded columns are sliced off below.
        x = jnp.pad(x, ((0, Bp - B), (0, 0)), constant_values=1.0)
    xT = x.T.astype(jnp.bfloat16)                 # (input_size, Bp), MXU-native operand

    r_in = _round_up(hidden + 1, _SEG_ALIGN)
    r_h = _round_up(hidden, _SEG_ALIGN)
    r_o = _round_up(out_dims, _SEG_ALIGN)
    kernel = _make_projector_kernel(n_hidden_layers, input_size, hidden, out_dims,
                                    r_in, r_h, r_o)

    flops = 2 * Bp * (input_size * (hidden + 1)
                      + n_hidden_layers * hidden * hidden
                      + hidden * out_dims)
    bytes_accessed = int(xT.size * 2 + Bp * out_dims * 4
                         + packed.size * packed.dtype.itemsize)

    out_t = pl.pallas_call(
        kernel,
        out_shape=jax.ShapeDtypeStruct((out_dims, Bp), jnp.float32),
        grid=grid,
        in_specs=[
            # batch-tiled, lane-dense input block
            pl.BlockSpec((input_size, tm), lambda i: (0, i)),
            # packed params: constant block index -> fetched once, VMEM-resident after.
            pl.BlockSpec(packed.shape, lambda i: (0, 0)),
        ],
        out_specs=pl.BlockSpec((out_dims, tm), lambda i: (0, i)),
        compiler_params=pltpu.CompilerParams(
            dimension_semantics=("parallel",),    # batch tiles independent -> megacore
        ),
        cost_estimate=pl.CostEstimate(
            flops=flops, transcendentals=2 * Bp, bytes_accessed=bytes_accessed),
    )(xT, packed)

    # Un-transpose in the wrapper; padded columns (garbage) are dropped here.
    return out_t.T[:B]


# ------------------------- parameter init / packing (plain JAX) -------------------------

def _xavier_normal(key, fan_in, fan_out):
    std = (2.0 / (fan_in + fan_out)) ** 0.5
    # torch-native (out, in) layout — exactly what the transposed kernel wants.
    return jax.random.normal(key, (fan_out, fan_in), jnp.float32) * std


def init_params(key, input_size, hidden_size, output_dims, n_hidden_layers):
    keys = jax.random.split(key, 3 + n_hidden_layers)
    return {
        "w_in": _xavier_normal(keys[0], input_size, hidden_size),       # (hidden, in)
        "b_in": jnp.zeros((hidden_size, 1), jnp.float32),
        "w_h": [_xavier_normal(keys[1 + l], hidden_size, hidden_size)
                for l in range(n_hidden_layers)],
        "b_h": [jnp.zeros((hidden_size, 1), jnp.float32)
                for _ in range(n_hidden_layers)],
        "w_out": _xavier_normal(keys[1 + n_hidden_layers], hidden_size, output_dims),
        "b_out": jnp.zeros((output_dims, 1), jnp.float32),
        # scaler: Linear(input_size, 1); deterministic normal init for this test.
        "w_sc": _xavier_normal(keys[2 + n_hidden_layers], input_size, 1),
        "b_sc": jnp.zeros((1, 1), jnp.float32),
    }


def pack_params(params, input_size, hidden, out_dims, n_hidden_layers):
    """Pack every weight/bias into one bf16 (rows, pack_w) buffer.

    Weights stay in torch-native (out, in) layout; biases are (out, 1) columns.
    Each segment is zero-padded to a multiple of 16 rows so every in-kernel slice
    starts and ends on a bf16 sublane-tile boundary (no relayout copies).  The scaler
    weight/bias are fused as an extra output row of the first layer."""
    pack_w = max(input_size, hidden)

    def seg(mat):
        rows = _round_up(mat.shape[0], _SEG_ALIGN)
        out = jnp.zeros((rows, pack_w), jnp.float32)
        return out.at[:mat.shape[0], :mat.shape[1]].set(mat)

    w_in_fused = jnp.concatenate([params["w_in"], params["w_sc"]], axis=0)  # (hid+1, in)
    b_in_fused = jnp.concatenate([params["b_in"], params["b_sc"]], axis=0)  # (hid+1, 1)

    segs = [seg(w_in_fused), seg(b_in_fused)]
    for l in range(n_hidden_layers):
        segs += [seg(params["w_h"][l]), seg(params["b_h"][l])]
    segs += [seg(params["w_out"]), seg(params["b_out"])]
    return jnp.concatenate(segs, axis=0).astype(jnp.bfloat16)


def projector_reference(x, params, n_hidden_layers):
    """Pure-JAX f32 reference (torch semantics, eval mode)."""
    h = jnp.maximum(x @ params["w_in"].T + params["b_in"].T, 0.0)
    for l in range(n_hidden_layers):
        h = jnp.maximum(h @ params["w_h"][l].T + params["b_h"][l].T, 0.0)
    d = h @ params["w_out"].T + params["b_out"].T
    direction = d / jnp.linalg.norm(d, axis=1, keepdims=True)
    scalers = jax.nn.sigmoid(x @ params["w_sc"].T + params["b_sc"].T)
    return direction * scalers


if __name__ == "__main__":
    # args: hyper_hidden_size=32, hyper_hidden_layers=2, hyper_output_dims=16,
    #       bias=1, projection_dropout=0.1 (eval mode -> identity)
    B = 200               # pads to 256 lanes -> exercises a 2-step ("parallel") grid
    INPUT_SIZE = 32
    HIDDEN = 32
    OUT_DIMS = 16
    N_HIDDEN_LAYERS = 2

    key = jax.random.PRNGKey(0)
    kx, kp = jax.random.split(key)
    x = jax.random.normal(kx, (B, INPUT_SIZE), jnp.float32)
    params = init_params(kp, INPUT_SIZE, HIDDEN, OUT_DIMS, N_HIDDEN_LAYERS)
    packed = pack_params(params, INPUT_SIZE, HIDDEN, OUT_DIMS, N_HIDDEN_LAYERS)

    out = projector_forward(
        x, packed,
        input_size=INPUT_SIZE, hidden=HIDDEN, out_dims=OUT_DIMS,
        n_hidden_layers=N_HIDDEN_LAYERS,
    )
    out = jax.block_until_ready(out)

    ref = projector_reference(x, params, N_HIDDEN_LAYERS)
    assert out.shape == (B, OUT_DIMS)
    assert not bool(jnp.any(jnp.isnan(out))), "NaN in kernel output"
    max_err = float(jnp.max(jnp.abs(out - ref)))
    # bf16 matmul operands (f32 accumulation) vs an all-f32 reference -> ~1e-2 tolerance.
    assert jnp.allclose(out, ref, atol=2e-2, rtol=2e-2), f"mismatch vs reference, max_err={max_err}"

    print("KERNEL_OK")
</pallas_src>

<mosaic_0001>
module attributes {stable_mosaic.version = 11 : i64} {
  func.func @kernel(%arg0: i32, %arg1: memref<32x128xbf16, #tpu.memory_space<vmem>>, %arg2: memref<256x32xbf16, #tpu.memory_space<vmem>>, %arg3: memref<16x128xf32, #tpu.memory_space<vmem>>) attributes {dimension_semantics = [#tpu.dimension_semantics<parallel>], iteration_bounds = array<i64: 2>, scalar_prefetch = 0 : i64, scratch_operands = 0 : i64, tpu.core_type = #tpu.core_type<tc>, window_params = [{transform_indices = @transform_0, window_bounds = array<i64: 32, 128>}, {pipeline_mode = #tpu.pipeline_mode<synchronous>, transform_indices = @transform_1, window_bounds = array<i64: 256, 32>}, {transform_indices = @transform_2, window_bounds = array<i64: 16, 128>}]} {
    %c0 = arith.constant 0 : index
    %c0_0 = arith.constant 0 : index
    %0 = vector.load %arg1[%c0, %c0_0] : memref<32x128xbf16, #tpu.memory_space<vmem>>, vector<32x128xbf16>
    %c0_1 = arith.constant 0 : index
    %c0_2 = arith.constant 0 : index
    %1 = vector.load %arg2[%c0_1, %c0_2] : memref<256x32xbf16, #tpu.memory_space<vmem>>, vector<48x32xbf16>
    %c48 = arith.constant 48 : index
    %c0_3 = arith.constant 0 : index
    %2 = vector.load %arg2[%c48, %c0_3] : memref<256x32xbf16, #tpu.memory_space<vmem>>, vector<48x1xbf16>
    %3 = arith.extf %2 : vector<48x1xbf16> to vector<48x1xf32>
    %cst = arith.constant dense<0.000000e+00> : vector<48x128xf32>
    %4 = tpu.matmul %1, %0, %cst {dimension_numbers = #tpu.dot_dimension_numbers<[1], [0], [0], [1], [0, 0, 1, 1], [], []>} : vector<48x32xbf16>, vector<32x128xbf16>, vector<48x128xf32> -> vector<48x128xf32>
    %5 = vector.broadcast %3 : vector<48x1xf32> to vector<48x128xf32>
    %6 = arith.addf %4, %5 : vector<48x128xf32>
    %7 = vector.extract_strided_slice %6 {offsets = [32, 0], sizes = [1, 128], strides = [1, 1]} : vector<48x128xf32> to vector<1x128xf32>
    %8 = vector.extract_strided_slice %6 {offsets = [0, 0], sizes = [32, 128], strides = [1, 1]} : vector<48x128xf32> to vector<32x128xf32>
    %cst_4 = arith.constant 0.000000e+00 : f32
    %9 = vector.broadcast %cst_4 : f32 to vector<32x128xf32>
    %10 = arith.maximumf %8, %9 : vector<32x128xf32>
    %c96 = arith.constant 96 : index
    %c0_5 = arith.constant 0 : index
    %11 = vector.load %arg2[%c96, %c0_5] : memref<256x32xbf16, #tpu.memory_space<vmem>>, vector<32x32xbf16>
    %c128 = arith.constant 128 : index
    %c0_6 = arith.constant 0 : index
    %12 = vector.load %arg2[%c128, %c0_6] : memref<256x32xbf16, #tpu.memory_space<vmem>>, vector<32x1xbf16>
    %13 = arith.extf %12 : vector<32x1xbf16> to vector<32x1xf32>
    %14 = arith.truncf %10 : vector<32x128xf32> to vector<32x128xbf16>
    %cst_7 = arith.constant dense<0.000000e+00> : vector<32x128xf32>
    %15 = tpu.matmul %11, %14, %cst_7 {dimension_numbers = #tpu.dot_dimension_numbers<[1], [0], [0], [1], [0, 0, 1, 1], [], []>} : vector<32x32xbf16>, vector<32x128xbf16>, vector<32x128xf32> -> vector<32x128xf32>
    %16 = vector.broadcast %13 : vector<32x1xf32> to vector<32x128xf32>
    %17 = arith.addf %15, %16 : vector<32x128xf32>
    %cst_8 = arith.constant 0.000000e+00 : f32
    %18 = vector.broadcast %cst_8 : f32 to vector<32x128xf32>
    %19 = arith.maximumf %17, %18 : vector<32x128xf32>
    %c160 = arith.constant 160 : index
    %c0_9 = arith.constant 0 : index
    %20 = vector.load %arg2[%c160, %c0_9] : memref<256x32xbf16, #tpu.memory_space<vmem>>, vector<32x32xbf16>
    %c192 = arith.constant 192 : index
    %c0_10 = arith.constant 0 : index
    %21 = vector.load %arg2[%c192, %c0_10] : memref<256x32xbf16, #tpu.memory_space<vmem>>, vector<32x1xbf16>
    %22 = arith.extf %21 : vector<32x1xbf16> to vector<32x1xf32>
    %23 = arith.truncf %19 : vector<32x128xf32> to vector<32x128xbf16>
    %cst_11 = arith.constant dense<0.000000e+00> : vector<32x128xf32>
    %24 = tpu.matmul %20, %23, %cst_11 {dimension_numbers = #tpu.dot_dimension_numbers<[1], [0], [0], [1], [0, 0, 1, 1], [], []>} : vector<32x32xbf16>, vector<32x128xbf16>, vector<32x128xf32> -> vector<32x128xf32>
    %25 = vector.broadcast %22 : vector<32x1xf32> to vector<32x128xf32>
    %26 = arith.addf %24, %25 : vector<32x128xf32>
    %cst_12 = arith.constant 0.000000e+00 : f32
    %27 = vector.broadcast %cst_12 : f32 to vector<32x128xf32>
    %28 = arith.maximumf %26, %27 : vector<32x128xf32>
    %c224 = arith.constant 224 : index
    %c0_13 = arith.constant 0 : index
    %29 = vector.load %arg2[%c224, %c0_13] : memref<256x32xbf16, #tpu.memory_space<vmem>>, vector<16x32xbf16>
    %c240 = arith.constant 240 : index
    %c0_14 = arith.constant 0 : index
    %30 = vector.load %arg2[%c240, %c0_14] : memref<256x32xbf16, #tpu.memory_space<vmem>>, vector<16x1xbf16>
    %31 = arith.extf %30 : vector<16x1xbf16> to vector<16x1xf32>
    %32 = arith.truncf %28 : vector<32x128xf32> to vector<32x128xbf16>
    %cst_15 = arith.constant dense<0.000000e+00> : vector<16x128xf32>
    %33 = tpu.matmul %29, %32, %cst_15 {dimension_numbers = #tpu.dot_dimension_numbers<[1], [0], [0], [1], [0, 0, 1, 1], [], []>} : vector<16x32xbf16>, vector<32x128xbf16>, vector<16x128xf32> -> vector<16x128xf32>
    %34 = vector.broadcast %31 : vector<16x1xf32> to vector<16x128xf32>
    %35 = arith.addf %33, %34 : vector<16x128xf32>
    %36 = arith.mulf %35, %35 : vector<16x128xf32>
    %cst_16 = arith.constant dense<0.000000e+00> : vector<128xf32>
    %37 = vector.multi_reduction <add>, %36, %cst_16 [0] : vector<16x128xf32> to vector<128xf32>
    %38 = vector.shape_cast %37 : vector<128xf32> to vector<1x128xf32>
    %39 = math.rsqrt %38 : vector<1x128xf32>
    %40 = vector.broadcast %39 : vector<1x128xf32> to vector<16x128xf32>
    %41 = arith.mulf %35, %40 : vector<16x128xf32>
    %cst_17 = arith.constant 0.000000e+00 : f32
    %42 = vector.broadcast %cst_17 : f32 to vector<1x128xf32>
    %43 = arith.subf %42, %7 : vector<1x128xf32>
    %44 = math.exp %43 : vector<1x128xf32>
    %cst_18 = arith.constant 1.000000e+00 : f32
    %45 = vector.broadcast %cst_18 : f32 to vector<1x128xf32>
    %46 = arith.addf %45, %44 : vector<1x128xf32>
    %cst_19 = arith.constant 1.000000e+00 : f32
    %47 = vector.broadcast %cst_19 : f32 to vector<1x128xf32>
    %48 = arith.divf %47, %46 : vector<1x128xf32>
    %49 = vector.broadcast %48 : vector<1x128xf32> to vector<16x128xf32>
    %50 = arith.mulf %41, %49 : vector<16x128xf32>
    %c0_20 = arith.constant 0 : index
    %c0_21 = arith.constant 0 : index
    %51 = vector.load %arg3[%c0_20, %c0_21] : memref<16x128xf32, #tpu.memory_space<vmem>>, vector<16x128xf32>
    tpu.vector_store %arg3[%c0_20, %c0_21], %50 {strides = array<i32>} : memref<16x128xf32, #tpu.memory_space<vmem>>, vector<16x128xf32>,
    return
  }
  func.func @transform_0(%arg0: i32) -> (i32, i32) {
    %c0_i32 = arith.constant 0 : i32
    %c0_i32_0 = arith.constant 0 : i32
    return %c0_i32, %arg0 : i32, i32
  }
  func.func @transform_1(%arg0: i32) -> (i32, i32) {
    %c0_i32 = arith.constant 0 : i32
    %c0_i32_0 = arith.constant 0 : i32
    %c0_i32_1 = arith.constant 0 : i32
    return %c0_i32, %c0_i32_0 : i32, i32
  }
  func.func @transform_2(%arg0: i32) -> (i32, i32) {
    %c0_i32 = arith.constant 0 : i32
    %c0_i32_0 = arith.constant 0 : i32
    return %c0_i32, %arg0 : i32, i32
  }
}

</mosaic_0001>

<bundles_post_ra>
// kernel: tpu_custom_call.1
= control target key start
LH: loop header
LB: loop body
LE: loop exit
PB: predicated region body
PF: predicated region fallthrough
CT: control target
= control target key end

     0   :  { %7 = vsyncpa [#allocation4], 0  ;;  %s1232_s0 = inlined_call_operand.vmem [shape: bf16[32,256], index: 0, kind: input, shape index: {}]   ;;  %s1233_s1 = inlined_call_operand.vmem [shape: bf16[256,32], index: 1, kind: input, shape index: {}]   ;;  %s1234_s2 = inlined_call_operand.hbm [shape: f32[16,256], index: 2, kind: output, shape index: {}]  }
   0x1   :  { %9 = vsyncpa [#allocation4 + $0x1], 0  ;;  %s1048_s9 = smov 0   ;;  %s1050_s10 = smov 0  }
   0x2   :  { %s1052_s11 = smov 0   ;;  %s1054_s12 = smov 0  }
   0x3 LB: > { %s723_s13 = sadd.s32 4294967295, %s1024_s12   ;;  %s724_s14 = sadd.s32 4294967294, %s1024_s12   ;;  %s1024_s12 = sphi %s1054_s12, %s1240_s12   ;;  %s1020_s11 = sphi %s1052_s11, %s1239_s11   ;;  %s1016_s10 = sphi %s1050_s10, %s1238_s10   ;;  %s1012_s9 = sphi %s1048_s9, %s1237_s9  }
   0x4   : > { %s1071_s15 = sadd.s32 1, %s1024_s12   ;;  %s22_s16 = sadd.s32 1, %s1020_s11 }
   0x5   : > { %s19_s17 = ssub.s32 %s1024_s12, %s1071_s15  ;;  %p29_p0 = scmp.ne.s32.totalorder %s1020_s11, %s1016_s10 }
   0x6   : > { %p20_p1 = scmp.eq.s32.totalorder %s19_s17, 0  ;;  %p30_p2 = scmp.eq.s32.totalorder %s1024_s12, 0 }
   0x7   : > { %p80_p3 = scmp.eq.s32.totalorder %s723_s13, 1  ;;  %p85_p4 = scmp.ne.s32.totalorder %s1016_s10, %s1012_s9 }
   0x8   : > { %s1084_s18 = scalar_select %p20_p1, %s1020_s11, %s22_s16  }
   0x9   : > { %p31_p5 = por %p30_p2, %p29_p0  ;;  %p1086_p6 = por %p80_p3, %p29_p0 }
   0xa   : > { %p86_p7 = scmp.eq.s32.totalorder %s724_s14, 1  ;;  %p726_p9 = scmp.ge.s32.totalorder %s1024_s12, 2 }
   0xc   : > { %p1090_p8 = por %p86_p7, %p85_p4  ;;  %105 = sbr.rel (%p726_p9) target bundleno = 26 (0x1a), region = 20 }
  0x13   : > { %108 = sbr.rel (!%p31_p5) target bundleno = 26 (0x1a), region = 24  ;;  %s110_s21 = sand.u32 (%p31_p5), 1, %s1020_s11  }
  0x14   : > { %s728_s22 = sshll.u32 (%p31_p5), %s1024_s12, 2  ;;  %s727_s23 = sshll.u32 (%p31_p5), %s110_s21, 4 }
  0x15   : > { %s114_s26 = scalar_lea.vmem (%p31_p5), %s1232_s0, %s728_s22  ;;  %s112_s27 = scalar_lea.vmem (%p31_p5), [#allocation2], %s727_s23 }
  0x16   : > { %v130_v0 = vld [vmem:[%s114_s26] sm:$0xf] (%p31_p5)  ;;  %v132_v1 = vld [vmem:[%s114_s26 + $0x8] sm:$0xf] (%p31_p5)  ;;  %v134_v2 = vld [vmem:[%s114_s26 + $0x10] sm:$0xf] (%p31_p5) }
  0x17   : > { %131 = vst [vmem:[%s112_s27] sm:$0xf] (%p31_p5), %v130_v0  ;;  %133 = vst [vmem:[%s112_s27 + $0x4] sm:$0xf] (%p31_p5), %v132_v1  ;;  %v136_v3 = vld [vmem:[%s114_s26 + $0x18] sm:$0xf] (%p31_p5) }
  0x18   : > { %135 = vst [vmem:[%s112_s27 + $0x8] sm:$0xf] (%p31_p5), %v134_v2  ;;  %137 = vst [vmem:[%s112_s27 + $0xc] sm:$0xf] (%p31_p5), %v136_v3 }
  0x1a PF: > { %p729_p10 = scmp.ge.s32.totalorder %s1024_s12, 1  ;;  %p167_p11 = scmp.lt.s32.totalorder %s1024_s12, 3 }
  0x1c   : > { %p168_p12 = pnand %p729_p10, %p167_p11 }
  0x1d   : > { %s174_s28 = sand.u32 (!%p168_p12), 1, %s1016_s10   ;;  %v1026_v4 = vmov (!%p168_p12), 0.0   ;;  %vm1027_vm0 = vmmov (!%p168_p12), 0   ;;  %v1028_v7 = vmov (!%p168_p12), 0   ;;  %vm274_vm1 = vcmask (!%p168_p12), 261120   ;;  %v786_v8 = vld [vmem:[%s1233_s1 + $0x18] sm:$0xff] (!%p168_p12)  }
  0x1e   : > { %171 = sbr.rel (%p168_p12) target bundleno = 992 (0x3e0), region = 65  ;;  %810 = vmatprep.subr.bf16.mxu0 (!%p168_p12), %v1026_v4  ;;  %s1108_s29 = sshll.u32 (!%p168_p12), %s174_s28, 4  ;;  %814 = vmatprep.mubr.msk.bf16.mxu0 (!%p168_p12), %vm1027_vm0, %v1026_v4  ;;  %v787_v9 = vld [vmem:[%s1233_s1 + $0x20] sm:$0xff] (!%p168_p12)   ;;  %v756_v11 = vunpack.c.l.bf16 (!%p168_p12), %v786_v8  ;;  %v757_v12 = vunpack.c.h.bf16 (!%p168_p12), %v786_v8  ;;  %v788_v20 = vld [vmem:[%s1233_s1 + $0x28] sm:$0xf] (!%p168_p12)   ;;  %v793_v21 = vld [vmem:[%s1233_s1 + $0x78] sm:$0xff] (!%p168_p12)  }
  0x1f   : > { %s176_s30 = scalar_lea.vmem (!%p168_p12), [#allocation2], %s1108_s29  ;;  %895 = vset.pattern.permute.xlu0 (!%p168_p12), %v1028_v7  ;;  %906 = vset.pattern.permute.xlu1 (!%p168_p12), %v1028_v7  ;;  %v934_v10 = vld [vmem:[%s1233_s1] sm:$0xff] (!%p168_p12)   ;;  %v760_v13 = vunpack.c.l.bf16 (!%p168_p12), %v787_v9  ;;  %v761_v14 = vunpack.c.h.bf16 (!%p168_p12), %v787_v9  ;;  %v764_v23 = vunpack.c.l.bf16 (!%p168_p12), %v788_v20  ;;  %v784_v24 = vunpack.c.l.bf16 (!%p168_p12), %v793_v21  ;;  %v935_v25 = vld [vmem:[%s1233_s1 + $0x8] sm:$0xff] (!%p168_p12)   ;;  %v936_v27 = vld [vmem:[%s1233_s1 + $0x10] sm:$0xff] (!%p168_p12)   ;;  %s194_s27 = scalar_lea.vmem (!%p168_p12), [#allocation3], %s1108_s29 }
  0x20   : > { %v932_v5 = vld [vmem:[%s176_s30] sm:$0xff] (!%p168_p12)   ;;  %v933_v6 = vld [vmem:[%s176_s30 + $0x8] sm:$0xff] (!%p168_p12)   ;;  %v896_v16 = vpack.i.bf16 (!%p168_p12), %v757_v12, %v756_v11  ;;  %v785_v41 = vunpack.c.h.bf16 (!%p168_p12), %v793_v21  ;;  %s656_s30 = sshll.u32 (!%p168_p12), %s194_s27, 4  ;;  %s751_s3 = sshll.u32 (!%p168_p12), %s723_s13, 7  ;;  %s1181_s30 = int_to_ptr.vmem [resolvable:$true] %s656_s30 }
  0x21   : > { %811 = vmatpush3.bf16.msra.mxu0 (!%p168_p12), %v932_v5  ;;  %v791_v15 = vld [vmem:[%s1233_s1 + $0x60] sm:$0xff] (!%p168_p12)   ;;  %v901_v17 = vpack.i.bf16 (!%p168_p12), %v761_v14, %v760_v13  ;;  %v927_v26 = vpack.i.bf16 (!%p168_p12), %v784_v24, %v764_v23  ;;  %v937_v28 = vld [vmem:[%s1233_s1 + $0x30] sm:$0xff] (!%p168_p12)   ;;  %v790_v30 = vld [vmem:[%s1233_s1 + $0x48] sm:$0xff] (!%p168_p12)   ;;  %s1186_s6 = scalar_lea.hbm (!%p168_p12), %s1234_s2, %s751_s3  ;;  %s1190_s13 = scalar_lea.sflag (!%p168_p12), [#allocation4], %s174_s28 }
  0x22   : > { %812 = vmatprep.subr.bf16.mxu0 (!%p168_p12), %v1026_v4  ;;  %897 = vperm.xlu0 (!%p168_p12), %895, %v896_v16   ;;  %v776_v18 = vunpack.c.l.bf16 (!%p168_p12), %v791_v15  ;;  %v777_v19 = vunpack.c.h.bf16 (!%p168_p12), %v791_v15  ;;  %v789_v29 = vld [vmem:[%s1233_s1 + $0x40] sm:$0xff] (!%p168_p12)   ;;  %v772_v33 = vunpack.c.l.bf16 (!%p168_p12), %v790_v30  ;;  %v773_v34 = vunpack.c.h.bf16 (!%p168_p12), %v790_v30  ;;  %v792_v35 = vld [vmem:[%s1233_s1 + $0x68] sm:$0xff] (!%p168_p12)   ;;  %v938_v63 = vld [vmem:[%s1233_s1 + $0x38] sm:$0xff] (!%p168_p12)   ;;  %s962_s29 = scalar_lea.vmem (!%p168_p12), %s1181_s30, 256  ;;  %s1029_s7 = smov (!%p168_p12), [#allocation3]  }
  0x23   : > { %830 = vmatprep.mubr.msk.bf16.mxu1 (!%p168_p12), %vm274_vm1, %v937_v28  ;;  %v768_v31 = vunpack.c.l.bf16 (!%p168_p12), %v789_v29  ;;  %v769_v32 = vunpack.c.h.bf16 (!%p168_p12), %v789_v29  ;;  %v780_v38 = vunpack.c.l.bf16 (!%p168_p12), %v792_v35  ;;  %v781_v39 = vunpack.c.h.bf16 (!%p168_p12), %v792_v35  ;;  %v939_v3 = vld [vmem:[%s1233_s1 + $0x50] sm:$0xff] (!%p168_p12)   ;;  %v940_v21 = vld [vmem:[%s1233_s1 + $0x58] sm:$0xff] (!%p168_p12)   ;;  %p963_p13 = scmp.ne.s32.totalorder (!%p168_p12), %s1181_s30, %s962_s29  ;;  %s966_s8 = sshll.u32 (!%p168_p12), %s1029_s7, 4  ;;  %s967_s8 = int_to_ptr.vmem [resolvable:$false] %s966_s8 }
  0x24   : > { %v917_v22 = vpack.i.bf16 (!%p168_p12), %v777_v19, %v776_v18  ;;  %v912_v37 = vpack.i.bf16 (!%p168_p12), %v773_v34, %v772_v33  ;;  %s968_s14 = scalar_lea.vmem (!%p168_p12), %s967_s8, 512  ;;  %p969_p2 = scmp.lt.s32.totalorder (!%p168_p12), %s1181_s30, %s967_s8 }
  0x25   : > { %813 = vmatpush3.bf16.msra.mxu0 %v933_v6  ;;  %v907_v36 = vpack.i.bf16 %v769_v32, %v768_v31  ;;  %v922_v40 = vpack.i.bf16 %v781_v39, %v780_v38  ;;  %v941_v38 = vld [vmem:[%s1233_s1 + $0x70] sm:$0xff]   ;;  %p964_p0 = pnand %p963_p13, %p1086_p6  ;;  %p970_p3 = scmp.lt.s32.totalorder %s968_s14, %s962_s29 }
  0x26   : > { %902 = vperm.xlu0 %895, %v901_v17  }
  0x27   : > { %908 = vperm.xlu1 %906, %v907_v36   ;;  %p965_p1 = pneg %p964_p0  ;;  %p971_p4 = por %p970_p3, %p969_p2 }
  0x28   : > { %815 = vmatmul.mubr.msk.bf16.vlgmr.msra.gmra.mrb[0].mxu0 %vm274_vm1, %v934_v10 }
  0x29   : > { %818 = vmatprep.mubr.msk.bf16.mxu0 %vm1027_vm0, %v1026_v4  ;;  %p972_p5 = pnand %p971_p4, %p965_p1 }
  0x2a   : > { %918 = vperm.xlu0 %895, %v917_v22  }
  0x2b   : > { %913 = vperm.xlu1 %906, %v912_v37  }
  0x2e   : > { %928 = vperm.xlu0 %895, %v927_v26  }
  0x2f   : > { %923 = vperm.xlu1 %906, %v922_v40  }
  0x30   : > { %819 = vmatmul.mubr.msk.bf16.gmra.mrb[4].mxu0 %vm274_vm1, %v935_v25 }
  0x31   : > { %822 = vmatprep.mubr.msk.bf16.mxu0 %vm1027_vm0, %v1026_v4 }
  0x33   : > { %565 = vperm.xlu1 %906, %v785_v41  }
  0x38   : > { %823 = vmatmul.mubr.msk.bf16.gmra.mrb[8].mxu0 %vm274_vm1, %v936_v27 }
  0xa1   : > { %v898_v42 = vpop.permute.xlu0 %897 }
  0xa5   : > { %v903_v51 = vpop.permute.xlu0 %902 }
  0xa6   : > { %v909_v5 = vpop.permute.xlu1 %908 }
  0xa9   : > { %v919_v23 = vpop.permute.xlu0 %918 }
  0xaa   : > { %v914_v6 = vpop.permute.xlu1 %913 }
  0xad   : > { %v929_v39 = vpop.permute.xlu0 %928 }
  0xae   : > { %v924_v22 = vpop.permute.xlu1 %923 }
  0xfb   : > { %v318_v43 = vpop.f32.mrb[0].mxu0 }
  0xfc   : > { %v948_v44 = vadd.low.f32.bf16 %v318_v43, %v898_v42  ;;  %v816_v45 = vpop.f32.mrb[1].mxu0 }
  0xfd   : > { %v321_v46 = vpop.f32.mrb[2].mxu0 }
  0xfe   : > { %v949_v47 = vadd.high.f32.bf16 %v321_v46, %v898_v42  ;;  %v817_v48 = vpop.f32.mrb[3].mxu0  ;;  %v340_v49 = vmax.f32 %v948_v44, 0.0  ;;  %v566_v46 = vpop.permute.xlu1 %565 }
 0x100   : > { %v341_v50 = vmax.f32 %v949_v47, 0.0 }
 0x102   : > { %v356_v52 = vpack.c.bf16 %v341_v50, %v340_v49 }
 0x103   : > { %v326_v53 = vpop.f32.mrb[4].mxu0 }
 0x104   : > { %v950_v54 = vadd.low.f32.bf16 %v326_v53, %v903_v51  ;;  %v820_v55 = vpop.f32.mrb[5].mxu0  ;;  %826 = vmatprep.subr.bf16.mxu1 %v356_v52 }
 0x105   : > { %v329_v56 = vpop.f32.mrb[6].mxu0  ;;  %827 = vmatpush3.bf16.msra.mxu1 %v356_v52 }
 0x106   : > { %v951_v57 = vadd.high.f32.bf16 %v329_v56, %v903_v51  ;;  %v821_v58 = vpop.f32.mrb[7].mxu0  ;;  %v342_v59 = vmax.f32 %v950_v54, 0.0 }
 0x108   : > { %v343_v60 = vmax.f32 %v951_v57, 0.0 }
 0x10a   : > { %v357_v61 = vpack.c.bf16 %v343_v60, %v342_v59  ;;  %v635_v60 = vlaneseq }
 0x10b   : > { %v334_v62 = vpop.f32.mrb[8].mxu0 }
 0x10c   : > { %828 = vmatprep.subr.bf16.mxu1 %v357_v61  ;;  %v824_v0 = vpop.f32.mrb[9].mxu0  ;;  %v960_v40 = vadd.low.f32.bf16 %v334_v62, %v929_v39 }
 0x10d   : > { %829 = vmatpush3.bf16.msra.mxu1 %v357_v61  ;;  %v337_v1 = vpop.f32.mrb[10].mxu0  ;;  %v636_v61 = vshrl.u32 %v635_v60, 7 }
 0x10e   : > { %v825_v2 = vpop.f32.mrb[11].mxu0  ;;  %v629_v41 = vsub.f32 0.0, %v960_v40 }
 0x10f   : > { %v637_v62 = vsub.s32 0, %v636_v61 }
 0x110   : > { %831 = vmatmul.mubr.msk.bf16.vlgmr.msra.gmra.mrb[0].mxu1 %vm274_vm1, %v938_v63  ;;  %v630_v42 = vmul.f32 1.442695, %v629_v41 }
 0x111   : > { %838 = vmatprep.mubr.msk.bf16.mxu1 %vm274_vm1, %v939_v3 }
 0x112   : > { %942 = vpow2.f32 %v630_v42 }
 0x11c   : > { %v943_v54 = vpop.eup %942 }
 0x11d   : > { %v632_v56 = vadd.f32 1.0, %v943_v54 }
 0x11f   : > { %944 = vrcp.f32 %v632_v56 }
 0x129   : > { %v945_v63 = vpop.eup %944 }
 0x12a   : > { %v638_v3 = vrot.slane %v945_v63, %v637_v62 }
 0x1e3   : > { %v832_v7 = vpop.f32.mrb[0].mxu1 }
 0x1e4   : > { %v952_v8 = vadd.low.f32.bf16 %v832_v7, %v914_v6  ;;  %v428_v9 = vpop.f32.mrb[1].mxu1 }
 0x1e5   : > { %v953_v10 = vadd.low.f32.bf16 %v428_v9, %v909_v5  ;;  %v833_v11 = vpop.f32.mrb[2].mxu1 }
 0x1e6   : > { %v954_v12 = vadd.high.f32.bf16 %v833_v11, %v914_v6  ;;  %v431_v13 = vpop.f32.mrb[3].mxu1  ;;  %v445_v15 = vmax.f32 %v952_v8, 0.0 }
 0x1e7   : > { %v955_v14 = vadd.high.f32.bf16 %v431_v13, %v909_v5  ;;  %v443_v17 = vmax.f32 %v953_v10, 0.0 }
 0x1e8   : > { %v446_v16 = vmax.f32 %v954_v12, 0.0 }
 0x1e9   : > { %v444_v18 = vmax.f32 %v955_v14, 0.0 }
 0x1ea   : > { %v460_v19 = vpack.c.bf16 %v446_v16, %v445_v15 }
 0x1eb   : > { %v459_v20 = vpack.c.bf16 %v444_v18, %v443_v17 }
 0x1ed   : > { %834 = vmatprep.subr.bf16.mxu1 %v459_v20 }
 0x1ee   : > { %835 = vmatpush3.bf16.msra.mxu1 %v459_v20 }
 0x1ef   : > { %836 = vmatprep.subr.bf16.mxu1 %v460_v19 }
 0x1f2   : > { %837 = vmatpush3.bf16.msra.mxu1 %v460_v19 }
 0x1f3   : > { %842 = vmatprep.subr.bf16.mxu1 %v1026_v4 }
 0x1f5   : > { %839 = vmatmul.mubr.msk.bf16.vlgmr.msra.gmra.mrb[4].mxu1 %vm274_vm1, %v940_v21 }
 0x1f6   : > { %846 = vmatprep.mubr.msk.bf16.mxu1 %vm1027_vm0, %v1026_v4 }
 0x2c8   : > { %v840_v24 = vpop.f32.mrb[4].mxu1 }
 0x2c9   : > { %v956_v25 = vadd.low.f32.bf16 %v840_v24, %v924_v22  ;;  %v531_v26 = vpop.f32.mrb[5].mxu1 }
 0x2ca   : > { %v957_v27 = vadd.low.f32.bf16 %v531_v26, %v919_v23  ;;  %v841_v28 = vpop.f32.mrb[6].mxu1 }
 0x2cb   : > { %v958_v29 = vadd.high.f32.bf16 %v841_v28, %v924_v22  ;;  %v534_v30 = vpop.f32.mrb[7].mxu1  ;;  %v548_v32 = vmax.f32 %v956_v25, 0.0 }
 0x2cc   : > { %v959_v31 = vadd.high.f32.bf16 %v534_v30, %v919_v23  ;;  %v546_v34 = vmax.f32 %v957_v27, 0.0 }
 0x2cd   : > { %v549_v33 = vmax.f32 %v958_v29, 0.0 }
 0x2ce   : > { %v547_v35 = vmax.f32 %v959_v31, 0.0 }
 0x2cf   : > { %v557_v36 = vpack.c.bf16 %v549_v33, %v548_v32 }
 0x2d0   : > { %v556_v37 = vpack.c.bf16 %v547_v35, %v546_v34 }
 0x2d2   : > { %843 = vmatpush3.bf16.msra.mxu1 %v556_v37 }
 0x2d3   : > { %844 = vmatprep.subr.bf16.mxu1 %v1026_v4 }
 0x2d6   : > { %845 = vmatpush3.bf16.msra.mxu1 %v557_v36 }
 0x2d9   : > { %847 = vmatmul.mubr.msk.bf16.vlgmr.msra.gmra.mrb[8].mxu1 %vm274_vm1, %v941_v38 }
 0x3ac   : > { %v610_v43 = vpop.f32.mrb[8].mxu1 }
 0x3ad   : > { %v961_v44 = vadd.high.f32.bf16 %v610_v43, %v929_v39  ;;  %v848_v45 = vpop.f32.mrb[9].mxu1 }
 0x3ae   : > { %v613_v47 = vpop.f32.mrb[10].mxu1 }
 0x3af   : > { %v614_v48 = vadd.f32 %v613_v47, %v566_v46  ;;  %v849_v49 = vpop.f32.mrb[11].mxu1  ;;  %v617_v4 = vmul.f32 %v961_v44, %v961_v44 }
 0x3b1   : > { %v618_v50 = vmul.f32 %v614_v48, %v614_v48 }
 0x3b3   : > { %v619_v51 = vadd.f32 %v618_v50, %v617_v4 }
 0x3b5   : > { %v620_v52 = vrot.slane %v619_v51, 4 }
 0x3b7   : > { %v621_v53 = vadd.f32 %v620_v52, %v619_v51 }
 0x3b9   : > { %v622_v55 = vrot.slane %v621_v53, 2 }
 0x3bb   : > { %v623_v57 = vadd.f32 %v622_v55, %v621_v53 }
 0x3bd   : > { %v624_v58 = vrot.slane %v623_v57, 1 }
 0x3bf   : > { %v625_v59 = vadd.f32 %v624_v58, %v623_v57 }
 0x3c1   : > { %946 = vrsqrt.f32 %v625_v59 }
 0x3cb   : > { %v947_v0 = vpop.eup %946 }
 0x3cc   : > { %v627_v1 = vmul.f32 %v961_v44, %v947_v0  ;;  %v628_v2 = vmul.f32 %v947_v0, %v614_v48 }
 0x3ce   : > { %v639_v5 = vmul.f32 %v638_v3, %v627_v1  ;;  %v640_v6 = vmul.f32 %v638_v3, %v628_v2 }
 0x3d0   : > { %641 = vst [vmem:[%s194_s27] sm:$0xff] %v639_v5  ;;  %642 = vst [vmem:[%s194_s27 + $0x8] sm:$0xff] %v640_v6 }
 0x3d1   : > { %975 = shalt.err (!%p972_p5)
}
 0x3d2   : > { %s976_s28 = scalar_lea.hbm %s1186_s6, 256  ;;  %s980_s21 = scalar_lea.hbm %s1234_s2, 512 }
 0x3d3   : > { %p977_p7 = scmp.ne.s32.totalorder %s1186_s6, %s976_s28  ;;  %p981_p12 = scmp.lt.u32.totalorder %s1186_s6, %s1234_s2 }
 0x3d4   : > { %p982_p13 = scmp.lt.u32.totalorder %s980_s21, %s976_s28  ;;  %p984_p1 = scmp.lt.u32.totalorder %s976_s28, %s1186_s6 }
 0x3d5   : > { %p978_p10 = pnand %p977_p7, %p1086_p6 }
 0x3d6   : > { %p983_p0 = por %p982_p13, %p981_p12 }
 0x3d7   : > { %p979_p11 = pneg %p978_p10 }
 0x3d8   : > { %p985_p2 = por %p984_p1, %p983_p0 }
 0x3da   : > { %p986_p3 = pnand %p985_p2, %p979_p11 }
 0x3dc   : > { %989 = shalt.err (!%p986_p3)
}
 0x3dd   : > { %s1030_s24 = smov 128   ;;  %s1031_s25 = smov 256  }
 0x3de   : > { %s1032_s26 = smov 8  }
 0x3df   : > { %850 = dma.vmem_to_hbm [thread:$0]  (%p1086_p6), %s1181_s30, 256, %s1186_s6, %s1190_s13, %s1030_s24, %s1031_s25, %s1032_s26  }
 0x3e0 PF: > { %s671_s27 = sand.u32 1, %s1012_s9   ;;  %p853_p4 = pnand %p726_p9, %p1090_p8 }
 0x3e1   : > { %s672_s3 = scalar_lea.sflag [#allocation4], %s671_s27 }
 0x3e2   : > { %1007 = dma.done.wait (!%p853_p4), %s672_s3, 256  }
 0x3e3   : > { %1009 = vsyncadd (!%p853_p4), %s672_s3, 4294967040  ;;  %p12_p5 = scmp.ge.s32.totalorder %s1071_s15, 4   ;;  %s1237_s9 = smov %s1016_s10 }
 0x3e4   : > { %s1238_s10 = smov %s1020_s11  ;;  %s1239_s11 = smov %s1084_s18 }
 0x3e5   : > { %s1240_s12 = smov %s1071_s15  ;;  %14 = sbr.rel (!%p12_p5) target bundleno = 3 (0x3), region = 109 }
 0x3ec   :  { %677 = vsyncpa [#allocation4], 1 }
 0x3ed   :  { %679 = vsyncpa [#allocation4 + $0x1], 1 }

</bundles_post_ra>
